<compile_context>
chip_gen: v6e
topology: v6e:2x2x1
jax: 0.10.0
libtpu: 0.0.40
codegen_flags: <defaults>
</compile_context>

<pallas_src>
import math

import numpy as np
import jax
import jax.numpy as jnp
from jax.scipy.linalg import block_diag
from jax.experimental import pallas as pl
from jax.experimental.pallas import tpu as pltpu


# -----------------------------------------------------------------------------
# Pallas kernel: fused  (masked slab) -> block-diag conv1x1 + LeakyReLU
#                                     -> block-diag merger conv1x1 (+ bm)
# Each 1x1-conv stack is a per-pixel matmul over channels; G pixels are packed
# side by side per row so every load/store is full-128-lane dense.
# -----------------------------------------------------------------------------
def fused_input_layer_kernel(x_ref, w1_ref, w2_ref, b2_ref, o_ref):
    x = x_ref[...]                                              # (TR, Kg) bf16
    # stage 1: [Wc 0; 0 We] with bc/be folded in via the ones column, LeakyReLU
    ce = jnp.dot(x, w1_ref[...], preferred_element_type=jnp.float32)
    ce = jnp.where(ce >= 0, ce, 0.01 * ce)                      # LeakyReLU(0.01)
    # stage 2: merger [Wmc; Wme] + bm
    # (stage-2 LHS kept bf16: passes 2e-2 tolerance; keep f32 LHS if tighter
    #  accuracy is ever required -- free on v6e/v7x, slower on v5e.)
    m = jnp.dot(ce.astype(jnp.bfloat16), w2_ref[...],
                preferred_element_type=jnp.float32) + b2_ref[...]
    o_ref[...] = m.astype(o_ref.dtype)                          # (TR, Ng) bf16, lane-dense


def fused_input_layer(slab_g, w1, w2, b2, *, max_tile_rows=1024, target_steps=8):
    Mg, Kg = slab_g.shape
    N1 = w1.shape[1]
    Ng = w2.shape[1]

    # >=4 grid steps (>=2 per v7x TensorCore) so the pipeline fills; per-step
    # overhead is only ~0.35us and VMEM is never the limiter at these sizes.
    tile = min(max_tile_rows, max(16, -(-Mg // target_steps)))
    tile = -(-tile // 16) * 16               # multiple of 16 (bf16 sublane packing)
    grid = pl.cdiv(Mg, tile)
    Mg_pad = grid * tile
    if Mg_pad != Mg:
        slab_g = jnp.pad(slab_g, ((0, Mg_pad - Mg), (0, 0)))

    # TODO(synk): mark w1/w2/b2 single-buffered (pipeline_mode=pl.Buffered(1))
    # once verified on the target jax version; saves ~0.6 MiB VMEM and a few
    # DMA descriptors per step (their index_map is constant).
    out = pl.pallas_call(
        fused_input_layer_kernel,
        out_shape=jax.ShapeDtypeStruct((Mg_pad, Ng), jnp.bfloat16),
        grid=(grid,),
        in_specs=[
            pl.BlockSpec((tile, Kg), lambda i: (i, 0)),   # packed pixel slab (bf16)
            pl.BlockSpec((Kg, N1), lambda i: (0, 0)),     # fused stage-1 weight (resident)
            pl.BlockSpec((N1, Ng), lambda i: (0, 0)),     # fused merger weight (resident)
            pl.BlockSpec((1, Ng), lambda i: (0, 0)),      # merger bias (f32)
        ],
        out_specs=pl.BlockSpec((tile, Ng), lambda i: (i, 0)),
        compiler_params=pltpu.CompilerParams(dimension_semantics=("parallel",)),
    )(slab_g, w1, w2, b2)
    return out[:Mg]


# -----------------------------------------------------------------------------
# Planning / fused-weight construction (hoisted out of the per-call forward)
# -----------------------------------------------------------------------------
def _device_kind():
    try:
        return jax.devices()[0].device_kind.lower()
    except Exception:
        return ""


def make_plan(n_cont, n_emb, out_dim):
    per_pix = n_cont + n_emb + 1                # +1 constant-1 column (bias fold)
    # Guard: pad out_dim to a power of two so the lane-dense group size
    # G = 128/out_dim_pad stays small (e.g. out_dim=24 would otherwise give
    # G=16 and a G^2-sized mostly-zero block-diagonal weight).
    if out_dim % 128 == 0 or 128 % out_dim == 0:
        out_dim_pad = out_dim
    else:
        out_dim_pad = 1 << (out_dim - 1).bit_length()
    g = 128 // math.gcd(out_dim_pad, 128)
    # v6e only: pack 2x more pixels per grouped row to cut K zero-padding
    # (36->48 lanes/pixel instead of 36->64).  Skip on v5e (would flip the
    # kernel MXU-bound) and v7x (marginal: ridge ~310 FLOP/B).
    kind = _device_kind()
    if "v6" in kind and g >= 2 and 2 * g <= 128:
        lane_q_big = 128 // g
        lane_q_small = 128 // (2 * g)
        pad_big = -(-per_pix // lane_q_big) * lane_q_big
        pad_small = -(-per_pix // lane_q_small) * lane_q_small
        if pad_small < pad_big:
            g *= 2
    lane_q = 128 // g
    per_pix_pad = -(-per_pix // lane_q) * lane_q        # => G*per_pix_pad % 128 == 0
    return dict(G=g, per_pix=per_pix, per_pix_pad=per_pix_pad,
                out_dim=out_dim, out_dim_pad=out_dim_pad,
                n_cont=n_cont, n_emb=n_emb)


def build_fused_weights(params, plan):
    """Builds the block-diagonal fused weights ONCE per parameter set."""
    G = plan["G"]
    per_pix_pad = plan["per_pix_pad"]
    out_dim, out_dim_pad = plan["out_dim"], plan["out_dim_pad"]
    n_cont, n_emb = plan["n_cont"], plan["n_emb"]

    # stage-1 per-pixel fused weight: [Wc 0; 0 We; bc be; 0 0]
    w1_pix = jnp.zeros((per_pix_pad, 2 * out_dim_pad), jnp.float32)
    w1_pix = w1_pix.at[:n_cont, :out_dim].set(params["Wc"])
    w1_pix = w1_pix.at[n_cont:n_cont + n_emb,
                       out_dim_pad:out_dim_pad + out_dim].set(params["We"])
    w1_pix = w1_pix.at[n_cont + n_emb, :out_dim].set(params["bc"][0])
    w1_pix = w1_pix.at[n_cont + n_emb,
                       out_dim_pad:out_dim_pad + out_dim].set(params["be"][0])
    # stage-2 per-pixel merger weight: [Wmc; Wme] (padded lanes stay zero)
    w2_pix = jnp.zeros((2 * out_dim_pad, out_dim_pad), jnp.float32)
    w2_pix = w2_pix.at[:out_dim, :out_dim].set(params["Wmc"])
    w2_pix = w2_pix.at[out_dim_pad:out_dim_pad + out_dim, :out_dim].set(params["Wme"])
    b2_pix = jnp.zeros((1, out_dim_pad), jnp.float32).at[:, :out_dim].set(params["bm"])

    W1 = block_diag(*([w1_pix] * G)).astype(jnp.bfloat16)   # (G*ppp,   G*2*odp)
    W2 = block_diag(*([w2_pix] * G)).astype(jnp.bfloat16)   # (G*2*odp, G*odp)
    b2 = jnp.tile(b2_pix, (1, G)).astype(jnp.float32)        # (1,       G*odp)
    return dict(W1=W1, W2=W2, b2=b2,
                emb_mb=params["emb_mb"], emb_md=params["emb_md"])


# -----------------------------------------------------------------------------
# JAX glue reproducing the torch forward pre-processing (channels-last)
# -----------------------------------------------------------------------------
def duplicate_swap_flatten(t):
    """torch: t[:, :, [[0..p-1],[p-1..0]], ...].transpose(1,2).flatten(0,1).flatten(1,2)
    (b, n, p, ...) -> (2b, n*p, ...)  (player order original / reversed)."""
    b, n, p = t.shape[0], t.shape[1], t.shape[2]
    idx = np.stack([np.arange(p), np.arange(p)[::-1]])            # (2, p)
    t2 = t[:, :, idx, ...]                                        # (b, n, 2, p, ...)
    t2 = jnp.swapaxes(t2, 1, 2)                                   # (b, 2, n, p, ...)
    return t2.reshape((b * 2, n * p) + t2.shape[4:])              # (2b, n*p, ...)


def _leaky(x):
    return jnp.where(x >= 0, x, 0.01 * x)


def make_forward(plan, embedding_dim):
    """Returns a jitted forward(obs, input_mask, fused) -> (merged NCHW f32, mask)."""
    G = plan["G"]
    per_pix, per_pix_pad = plan["per_pix"], plan["per_pix_pad"]
    out_dim, out_dim_pad = plan["out_dim"], plan["out_dim_pad"]

    def forward(obs, input_mask, fused):
        b, H, W = input_mask.shape[0], input_mask.shape[2], input_mask.shape[3]
        B2 = 2 * b
        mask_rep = jnp.repeat(input_mask, 2, axis=0)              # repeat_interleave dim 0
        mask_nhwc = jnp.transpose(mask_rep, (0, 2, 3, 1))         # (2b,H,W,1)

        # --- continuous observations (channels-last) --------------------------
        cont = jnp.concatenate([duplicate_swap_flatten(obs["box_a"]),
                                duplicate_swap_flatten(obs["box_b"])], axis=1)
        cont = jnp.transpose(cont, (0, 2, 3, 1)).astype(jnp.float32)  # (2b,H,W,3)

        # --- embedding observations (sum_player_embeddings=True, index_select)
        def embed(key, weight):
            o = duplicate_swap_flatten(obs[key]).astype(jnp.int32)    # (2b,p,H,W)
            if o.shape[1] == 2:
                off = (weight.shape[0] - 1) // 2
                o = o.at[:, 1].set(jnp.where(o[:, 1] != 0, o[:, 1] + off, o[:, 1]))
            e = jnp.take(weight, o, axis=0)                           # (2b,p,H,W,D)
            return jnp.sum(e, axis=1)                                 # _player_sum

        emb_mb = embed("mb", fused["emb_mb"])
        emb_md = embed("md", fused["emb_md"])

        # --- mb_COUNT modulation ----------------------------------------------
        cnt = jnp.transpose(duplicate_swap_flatten(obs["mb_COUNT"]), (0, 2, 3, 1))
        emb_mb = (emb_mb.reshape(B2, H, W, 2, embedding_dim // 2) * cnt[..., None]
                  ).reshape(B2, H, W, embedding_dim)
        emb = jnp.concatenate([emb_mb, emb_md], axis=-1)              # (2b,H,W,2D)

        # --- pack ONE lane-dense bf16 slab --------------------------------------
        feats = (jnp.concatenate([cont, emb], axis=-1) * mask_nhwc).astype(jnp.bfloat16)
        slab = jnp.concatenate(
            [feats,
             jnp.ones((B2, H, W, 1), jnp.bfloat16),                   # un-masked bias col
             jnp.zeros((B2, H, W, per_pix_pad - per_pix), jnp.bfloat16)], axis=-1)
        M_pix = B2 * H * W
        slab = slab.reshape(M_pix, per_pix_pad)
        M_pix_pad = -(-M_pix // G) * G
        if M_pix_pad != M_pix:
            slab = jnp.pad(slab, ((0, M_pix_pad - M_pix), (0, 0)))
        slab_g = slab.reshape(M_pix_pad // G, G * per_pix_pad)        # bf16, lane-dense

        out_g = fused_input_layer(slab_g, fused["W1"], fused["W2"], fused["b2"])
        # free row-major reshape back to per-pixel rows; slice off padded lanes/rows
        out_rows = out_g.reshape(M_pix_pad, out_dim_pad)[:M_pix, :out_dim]
        merged = out_rows.reshape(B2, H, W, out_dim)
        # TODO(synk): return NHWC (and bf16) and skip the transpose + f32 cast if
        # downstream consumers allow it -- it is a full extra HBM pass.
        merged = jnp.transpose(merged, (0, 3, 1, 2)).astype(jnp.float32)  # NCHW (torch)
        return merged, mask_rep

    return jax.jit(forward)


# -----------------------------------------------------------------------------
# pure-JAX f32 reference mirroring the torch module math exactly (for the check)
# -----------------------------------------------------------------------------
def reference_forward(obs, input_mask, params, embedding_dim, out_dim):
    b, H, W = input_mask.shape[0], input_mask.shape[2], input_mask.shape[3]
    mask = jnp.repeat(input_mask, 2, axis=0)
    cont = jnp.concatenate([duplicate_swap_flatten(obs["box_a"]),
                            duplicate_swap_flatten(obs["box_b"])], axis=1) * mask

    def embed_nchw(key, w):
        o = duplicate_swap_flatten(obs[key]).astype(jnp.int32)
        if o.shape[1] == 2:
            off = (w.shape[0] - 1) // 2
            o = o.at[:, 1].set(jnp.where(o[:, 1] != 0, o[:, 1] + off, o[:, 1]))
        e = jnp.transpose(jnp.take(w, o, axis=0), (0, 1, 4, 2, 3))
        return jnp.sum(e, axis=1) * mask

    e_mb = embed_nchw("mb", params["emb_mb"])
    cnt = duplicate_swap_flatten(obs["mb_COUNT"])
    e_mb = (e_mb.reshape(2 * b, 2, embedding_dim // 2, H, W)
            * cnt[:, :, None]).reshape(2 * b, embedding_dim, H, W)
    e_md = embed_nchw("md", params["emb_md"])
    embc = jnp.concatenate([e_mb, e_md], axis=1)

    c = _leaky(jnp.einsum('bchw,cd->bdhw', cont, params["Wc"])
               + params["bc"].reshape(1, -1, 1, 1))
    e = _leaky(jnp.einsum('bchw,cd->bdhw', embc, params["We"])
               + params["be"].reshape(1, -1, 1, 1))
    m = (jnp.einsum('bchw,cd->bdhw', c, params["Wmc"])
         + jnp.einsum('bchw,cd->bdhw', e, params["Wme"])
         + params["bm"].reshape(1, -1, 1, 1))
    return m, mask


# -----------------------------------------------------------------------------
if __name__ == "__main__":
    b, H, W = 2, 16, 16
    embedding_dim = 16          # must be even for the *_COUNT path
    out_dim = 32
    n_cont = 3                  # box_a (p=2) + box_b (p=1)
    n_emb = 2 * embedding_dim   # mb + md (sum_player_embeddings=True)

    key = jax.random.PRNGKey(0)
    ks = jax.random.split(key, 16)

    # ---- deterministic parameters (shapes follow the module __init__) -------
    emb_mb = jax.random.normal(ks[0], (2 * (2 - 1) + 1, embedding_dim), jnp.float32) * 0.1
    emb_mb = emb_mb.at[0].set(0.0)                                # padding_idx=0
    emb_md = jax.random.normal(ks[1], (2 * (4 - 1) + 1, embedding_dim), jnp.float32) * 0.1
    params = dict(
        emb_mb=emb_mb,
        emb_md=emb_md,
        Wc=jax.random.normal(ks[2], (n_cont, out_dim), jnp.float32) * 0.1,
        bc=jax.random.normal(ks[3], (1, out_dim), jnp.float32) * 0.1,
        We=jax.random.normal(ks[4], (n_emb, out_dim), jnp.float32) * 0.1,
        be=jax.random.normal(ks[5], (1, out_dim), jnp.float32) * 0.1,
        Wmc=jax.random.normal(ks[6], (out_dim, out_dim), jnp.float32) * 0.1,
        Wme=jax.random.normal(ks[7], (out_dim, out_dim), jnp.float32) * 0.1,
        bm=jax.random.normal(ks[8], (1, out_dim), jnp.float32) * 0.1,
    )

    # ---- deterministic example observations ----------------------------------
    obs = dict(
        box_a=jax.random.normal(ks[9], (b, 1, 2, H, W), jnp.float32),
        box_b=jax.random.normal(ks[10], (b, 1, 1, H, W), jnp.float32),
        mb=jax.random.randint(ks[11], (b, 1, 2, H, W), 0, 2).astype(jnp.int32),
        mb_COUNT=jax.random.uniform(ks[12], (b, 1, 2, H, W), jnp.float32, 0.0, 3.0),
        md=jax.random.randint(ks[13], (b, 1, 2, H, W), 0, 4).astype(jnp.int32),
    )
    input_mask = (jax.random.uniform(ks[14], (b, 1, H, W)) < 0.8).astype(jnp.float32)

    # ---- plan + fused weights built ONCE per parameter set --------------------
    plan = make_plan(n_cont, n_emb, out_dim)
    fused = build_fused_weights(params, plan)
    forward = make_forward(plan, embedding_dim)

    merged, mask_rep = forward(obs, input_mask, fused)
    merged = jax.block_until_ready(merged)
    mask_rep = jax.block_until_ready(mask_rep)

    assert merged.shape == (2 * b, out_dim, H, W)
    assert mask_rep.shape == (2 * b, 1, H, W)

    # ---- check against the f32 pure-JAX reference of the full module forward --
    ref, ref_mask = reference_forward(obs, input_mask, params, embedding_dim, out_dim)
    np.testing.assert_allclose(np.asarray(mask_rep), np.asarray(ref_mask))
    # kernel runs bf16 inputs/weights/output with f32 MXU accumulation
    np.testing.assert_allclose(np.asarray(merged), np.asarray(ref), rtol=2e-2, atol=2e-2)
    print("KERNEL_OK")
</pallas_src>

<mosaic_0001>
module attributes {stable_mosaic.version = 11 : i64} {
  func.func @fused_input_layer_kernel(%arg0: i32, %arg1: memref<32x256xbf16, #tpu.memory_space<vmem>>, %arg2: memref<256x256xbf16, #tpu.memory_space<vmem>>, %arg3: memref<256x128xbf16, #tpu.memory_space<vmem>>, %arg4: memref<1x128xf32, #tpu.memory_space<vmem>>, %arg5: memref<32x128xbf16, #tpu.memory_space<vmem>>) attributes {dimension_semantics = [#tpu.dimension_semantics<parallel>], iteration_bounds = array<i64: 8>, scalar_prefetch = 0 : i64, scratch_operands = 0 : i64, tpu.core_type = #tpu.core_type<tc>, window_params = [{transform_indices = @transform_0, window_bounds = array<i64: 32, 256>}, {pipeline_mode = #tpu.pipeline_mode<synchronous>, transform_indices = @transform_1, window_bounds = array<i64: 256, 256>}, {pipeline_mode = #tpu.pipeline_mode<synchronous>, transform_indices = @transform_2, window_bounds = array<i64: 256, 128>}, {pipeline_mode = #tpu.pipeline_mode<synchronous>, transform_indices = @transform_3, window_bounds = array<i64: 1, 128>}, {transform_indices = @transform_4, window_bounds = array<i64: 32, 128>}]} {
    %c0 = arith.constant 0 : index
    %c0_0 = arith.constant 0 : index
    %0 = vector.load %arg1[%c0, %c0_0] : memref<32x256xbf16, #tpu.memory_space<vmem>>, vector<32x256xbf16>
    %c0_1 = arith.constant 0 : index
    %c0_2 = arith.constant 0 : index
    %1 = vector.load %arg2[%c0_1, %c0_2] : memref<256x256xbf16, #tpu.memory_space<vmem>>, vector<256x256xbf16>
    %cst = arith.constant dense<0.000000e+00> : vector<32x256xf32>
    %2 = tpu.matmul %0, %1, %cst {dimension_numbers = #tpu.dot_dimension_numbers<[1], [0], [0], [1], [0, 0, 1, 1], [], []>} : vector<32x256xbf16>, vector<256x256xbf16>, vector<32x256xf32> -> vector<32x256xf32>
    %cst_3 = arith.constant 0.000000e+00 : f32
    %3 = vector.broadcast %cst_3 : f32 to vector<32x256xf32>
    %4 = arith.cmpf oge, %2, %3 : vector<32x256xf32>
    %cst_4 = arith.constant 0.00999999977 : f32
    %5 = vector.broadcast %cst_4 : f32 to vector<32x256xf32>
    %6 = arith.mulf %5, %2 : vector<32x256xf32>
    %7 = arith.select %4, %2, %6 : vector<32x256xi1>, vector<32x256xf32>
    %8 = arith.truncf %7 : vector<32x256xf32> to vector<32x256xbf16>
    %c0_5 = arith.constant 0 : index
    %c0_6 = arith.constant 0 : index
    %9 = vector.load %arg3[%c0_5, %c0_6] : memref<256x128xbf16, #tpu.memory_space<vmem>>, vector<256x128xbf16>
    %cst_7 = arith.constant dense<0.000000e+00> : vector<32x128xf32>
    %10 = tpu.matmul %8, %9, %cst_7 {dimension_numbers = #tpu.dot_dimension_numbers<[1], [0], [0], [1], [0, 0, 1, 1], [], []>} : vector<32x256xbf16>, vector<256x128xbf16>, vector<32x128xf32> -> vector<32x128xf32>
    %c0_8 = arith.constant 0 : index
    %c0_9 = arith.constant 0 : index
    %11 = vector.load %arg4[%c0_8, %c0_9] : memref<1x128xf32, #tpu.memory_space<vmem>>, vector<1x128xf32>
    %12 = vector.broadcast %11 : vector<1x128xf32> to vector<32x128xf32>
    %13 = arith.addf %10, %12 : vector<32x128xf32>
    %14 = arith.truncf %13 : vector<32x128xf32> to vector<32x128xbf16>
    %c0_10 = arith.constant 0 : index
    %c0_11 = arith.constant 0 : index
    %15 = vector.load %arg5[%c0_10, %c0_11] : memref<32x128xbf16, #tpu.memory_space<vmem>>, vector<32x128xbf16>
    tpu.vector_store %arg5[%c0_10, %c0_11], %14 {strides = array<i32>} : memref<32x128xbf16, #tpu.memory_space<vmem>>, vector<32x128xbf16>,
    return
  }
  func.func @transform_0(%arg0: i32) -> (i32, i32) {
    %c0_i32 = arith.constant 0 : i32
    %c0_i32_0 = arith.constant 0 : i32
    return %arg0, %c0_i32 : i32, i32
  }
  func.func @transform_1(%arg0: i32) -> (i32, i32) {
    %c0_i32 = arith.constant 0 : i32
    %c0_i32_0 = arith.constant 0 : i32
    %c0_i32_1 = arith.constant 0 : i32
    return %c0_i32, %c0_i32_0 : i32, i32
  }
  func.func @transform_2(%arg0: i32) -> (i32, i32) {
    %c0_i32 = arith.constant 0 : i32
    %c0_i32_0 = arith.constant 0 : i32
    %c0_i32_1 = arith.constant 0 : i32
    return %c0_i32, %c0_i32_0 : i32, i32
  }
  func.func @transform_3(%arg0: i32) -> (i32, i32) {
    %c0_i32 = arith.constant 0 : i32
    %c0_i32_0 = arith.constant 0 : i32
    %c0_i32_1 = arith.constant 0 : i32
    return %c0_i32, %c0_i32_0 : i32, i32
  }
  func.func @transform_4(%arg0: i32) -> (i32, i32) {
    %c0_i32 = arith.constant 0 : i32
    %c0_i32_0 = arith.constant 0 : i32
    return %arg0, %c0_i32 : i32, i32
  }
}

</mosaic_0001>

<bundles_post_ra>
// kernel: mul.0
= control target key start
LH: loop header
LB: loop body
LE: loop exit
PB: predicated region body
PF: predicated region fallthrough
CT: control target
= control target key end

     0   :  { %s2828_s0 = inlined_call_operand.vmem [shape: f32[4,16,16,16], index: 0, kind: input, shape index: {}]   ;;  %s2829_s1 = inlined_call_operand.vmem [shape: f32[4,16,16,16], index: 1, kind: input, shape index: {}]   ;;  %s2830_s2 = inlined_call_operand.vmem [shape: f32[4,16,16,16], index: 2, kind: output, shape index: {}]  }
   0x1   :  { %v3_v0 = vld [vmem:[%s2828_s0] sm:$0xff]  ;;  %v1289_v11 = vld [vmem:[%s2828_s0 + $0x10] sm:$0xff] }
   0x2   :  { %v4_v1 = vld [vmem:[%s2829_s1] sm:$0xff]  ;;  %v1290_v13 = vld [vmem:[%s2829_s1 + $0x10] sm:$0xff] }
   0x3   :  { %v1280_v2 = vld [vmem:[%s2828_s0 + $0x100] sm:$0xff]  ;;  %v7_v3 = vmul.f32 %v4_v1, %v3_v0  ;;  %v1292_v14 = vld [vmem:[%s2828_s0 + $0x110] sm:$0xff]  ;;  %v46_v16 = vmul.f32 %v1290_v13, %v1289_v11 }
   0x4   :  { %v1281_v4 = vld [vmem:[%s2829_s1 + $0x100] sm:$0xff]  ;;  %v1293_v15 = vld [vmem:[%s2829_s1 + $0x110] sm:$0xff] }
   0x5   :  { %v1283_v5 = vld [vmem:[%s2828_s0 + $0x200] sm:$0xff]  ;;  %v16_v7 = vmul.f32 %v1281_v4, %v1280_v2  ;;  %9 = vst [vmem:[%s2830_s2] sm:$0xff] %v7_v3  ;;  %v56_v17 = vmul.f32 %v1293_v15, %v1292_v14  ;;  %v1295_v18 = vld [vmem:[%s2828_s0 + $0x210] sm:$0xff]  ;;  %1291 = vst [vmem:[%s2830_s2 + $0x10] sm:$0xff] %v46_v16 }
   0x6   :  { %v1284_v6 = vld [vmem:[%s2829_s1 + $0x200] sm:$0xff]  ;;  %v1296_v19 = vld [vmem:[%s2829_s1 + $0x210] sm:$0xff] }
   0x7   :  { %v26_v8 = vmul.f32 %v1284_v6, %v1283_v5  ;;  %v1286_v9 = vld [vmem:[%s2828_s0 + $0x300] sm:$0xff]  ;;  %1282 = vst [vmem:[%s2830_s2 + $0x100] sm:$0xff] %v16_v7  ;;  %v1298_v20 = vld [vmem:[%s2828_s0 + $0x310] sm:$0xff]  ;;  %v66_v21 = vmul.f32 %v1296_v19, %v1295_v18  ;;  %1294 = vst [vmem:[%s2830_s2 + $0x110] sm:$0xff] %v56_v17 }
   0x8   :  { %v1287_v10 = vld [vmem:[%s2829_s1 + $0x300] sm:$0xff]  ;;  %v1299_v22 = vld [vmem:[%s2829_s1 + $0x310] sm:$0xff] }
   0x9   :  { %v36_v12 = vmul.f32 %v1287_v10, %v1286_v9  ;;  %1285 = vst [vmem:[%s2830_s2 + $0x200] sm:$0xff] %v26_v8  ;;  %v1301_v23 = vld [vmem:[%s2828_s0 + $0x20] sm:$0xff]  ;;  %v76_v25 = vmul.f32 %v1299_v22, %v1298_v20  ;;  %1297 = vst [vmem:[%s2830_s2 + $0x210] sm:$0xff] %v66_v21  ;;  %v1313_v36 = vld [vmem:[%s2828_s0 + $0x30] sm:$0xff] }
   0xa   :  { %v1302_v24 = vld [vmem:[%s2829_s1 + $0x20] sm:$0xff]  ;;  %v1314_v37 = vld [vmem:[%s2829_s1 + $0x30] sm:$0xff] }
   0xb   :  { %1288 = vst [vmem:[%s2830_s2 + $0x300] sm:$0xff] %v36_v12  ;;  %v86_v26 = vmul.f32 %v1302_v24, %v1301_v23  ;;  %v1304_v27 = vld [vmem:[%s2828_s0 + $0x120] sm:$0xff]  ;;  %1300 = vst [vmem:[%s2830_s2 + $0x310] sm:$0xff] %v76_v25  ;;  %v1316_v38 = vld [vmem:[%s2828_s0 + $0x130] sm:$0xff]  ;;  %v126_v39 = vmul.f32 %v1314_v37, %v1313_v36 }
   0xc   :  { %v1305_v28 = vld [vmem:[%s2829_s1 + $0x120] sm:$0xff]  ;;  %v1317_v40 = vld [vmem:[%s2829_s1 + $0x130] sm:$0xff] }
   0xd   :  { %v1307_v29 = vld [vmem:[%s2828_s0 + $0x220] sm:$0xff]  ;;  %v96_v30 = vmul.f32 %v1305_v28, %v1304_v27  ;;  %1303 = vst [vmem:[%s2830_s2 + $0x20] sm:$0xff] %v86_v26  ;;  %v1319_v41 = vld [vmem:[%s2828_s0 + $0x230] sm:$0xff]  ;;  %v136_v43 = vmul.f32 %v1317_v40, %v1316_v38  ;;  %1315 = vst [vmem:[%s2830_s2 + $0x30] sm:$0xff] %v126_v39 }
   0xe   :  { %v1308_v31 = vld [vmem:[%s2829_s1 + $0x220] sm:$0xff]  ;;  %v1320_v42 = vld [vmem:[%s2829_s1 + $0x230] sm:$0xff] }
   0xf   :  { %v1310_v32 = vld [vmem:[%s2828_s0 + $0x320] sm:$0xff]  ;;  %v106_v34 = vmul.f32 %v1308_v31, %v1307_v29  ;;  %1306 = vst [vmem:[%s2830_s2 + $0x120] sm:$0xff] %v96_v30  ;;  %v146_v44 = vmul.f32 %v1320_v42, %v1319_v41  ;;  %v1322_v45 = vld [vmem:[%s2828_s0 + $0x330] sm:$0xff]  ;;  %1318 = vst [vmem:[%s2830_s2 + $0x130] sm:$0xff] %v136_v43 }
  0x10   :  { %v1311_v33 = vld [vmem:[%s2829_s1 + $0x320] sm:$0xff]  ;;  %v1323_v46 = vld [vmem:[%s2829_s1 + $0x330] sm:$0xff] }
  0x11   :  { %v116_v35 = vmul.f32 %v1311_v33, %v1310_v32  ;;  %1309 = vst [vmem:[%s2830_s2 + $0x220] sm:$0xff] %v106_v34  ;;  %v1325_v47 = vld [vmem:[%s2828_s0 + $0x40] sm:$0xff]  ;;  %v156_v48 = vmul.f32 %v1323_v46, %v1322_v45  ;;  %1321 = vst [vmem:[%s2830_s2 + $0x230] sm:$0xff] %v146_v44  ;;  %v1337_v59 = vld [vmem:[%s2828_s0 + $0x50] sm:$0xff] }
  0x12   :  { %v1326_v49 = vld [vmem:[%s2829_s1 + $0x40] sm:$0xff]  ;;  %v1338_v60 = vld [vmem:[%s2829_s1 + $0x50] sm:$0xff] }
  0x13   :  { %1312 = vst [vmem:[%s2830_s2 + $0x320] sm:$0xff] %v116_v35  ;;  %v1328_v50 = vld [vmem:[%s2828_s0 + $0x140] sm:$0xff]  ;;  %v166_v52 = vmul.f32 %v1326_v49, %v1325_v47  ;;  %1324 = vst [vmem:[%s2830_s2 + $0x330] sm:$0xff] %v156_v48  ;;  %v206_v62 = vmul.f32 %v1338_v60, %v1337_v59  ;;  %v1340_v63 = vld [vmem:[%s2828_s0 + $0x150] sm:$0xff] }
  0x14   :  { %v1329_v51 = vld [vmem:[%s2829_s1 + $0x140] sm:$0xff]  ;;  %v1341_v0 = vld [vmem:[%s2829_s1 + $0x150] sm:$0xff] }
  0x15   :  { %v176_v53 = vmul.f32 %v1329_v51, %v1328_v50  ;;  %v1331_v54 = vld [vmem:[%s2828_s0 + $0x240] sm:$0xff]  ;;  %1327 = vst [vmem:[%s2830_s2 + $0x40] sm:$0xff] %v166_v52  ;;  %v1343_v1 = vld [vmem:[%s2828_s0 + $0x250] sm:$0xff]  ;;  %v216_v2 = vmul.f32 %v1341_v0, %v1340_v63  ;;  %1339 = vst [vmem:[%s2830_s2 + $0x50] sm:$0xff] %v206_v62 }
  0x16   :  { %v1332_v55 = vld [vmem:[%s2829_s1 + $0x240] sm:$0xff]  ;;  %v1344_v3 = vld [vmem:[%s2829_s1 + $0x250] sm:$0xff] }
  0x17   :  { %v1334_v56 = vld [vmem:[%s2828_s0 + $0x340] sm:$0xff]  ;;  %v186_v57 = vmul.f32 %v1332_v55, %v1331_v54  ;;  %1330 = vst [vmem:[%s2830_s2 + $0x140] sm:$0xff] %v176_v53  ;;  %v1346_v4 = vld [vmem:[%s2828_s0 + $0x350] sm:$0xff]  ;;  %v226_v6 = vmul.f32 %v1344_v3, %v1343_v1  ;;  %1342 = vst [vmem:[%s2830_s2 + $0x150] sm:$0xff] %v216_v2 }
  0x18   :  { %v1335_v58 = vld [vmem:[%s2829_s1 + $0x340] sm:$0xff]  ;;  %v1347_v5 = vld [vmem:[%s2829_s1 + $0x350] sm:$0xff] }
  0x19   :  { %v196_v61 = vmul.f32 %v1335_v58, %v1334_v56  ;;  %1333 = vst [vmem:[%s2830_s2 + $0x240] sm:$0xff] %v186_v57  ;;  %v236_v7 = vmul.f32 %v1347_v5, %v1346_v4  ;;  %v1349_v8 = vld [vmem:[%s2828_s0 + $0x60] sm:$0xff]  ;;  %1345 = vst [vmem:[%s2830_s2 + $0x250] sm:$0xff] %v226_v6  ;;  %v1361_v19 = vld [vmem:[%s2828_s0 + $0x70] sm:$0xff] }
  0x1a   :  { %v1350_v9 = vld [vmem:[%s2829_s1 + $0x60] sm:$0xff]  ;;  %v1362_v21 = vld [vmem:[%s2829_s1 + $0x70] sm:$0xff] }
  0x1b   :  { %1336 = vst [vmem:[%s2830_s2 + $0x340] sm:$0xff] %v196_v61  ;;  %v1352_v10 = vld [vmem:[%s2828_s0 + $0x160] sm:$0xff]  ;;  %v246_v11 = vmul.f32 %v1350_v9, %v1349_v8  ;;  %1348 = vst [vmem:[%s2830_s2 + $0x350] sm:$0xff] %v236_v7  ;;  %v1364_v22 = vld [vmem:[%s2828_s0 + $0x170] sm:$0xff]  ;;  %v286_v24 = vmul.f32 %v1362_v21, %v1361_v19 }
  0x1c   :  { %v1353_v12 = vld [vmem:[%s2829_s1 + $0x160] sm:$0xff]  ;;  %v1365_v23 = vld [vmem:[%s2829_s1 + $0x170] sm:$0xff] }
  0x1d   :  { %v1355_v13 = vld [vmem:[%s2828_s0 + $0x260] sm:$0xff]  ;;  %v256_v15 = vmul.f32 %v1353_v12, %v1352_v10  ;;  %1351 = vst [vmem:[%s2830_s2 + $0x60] sm:$0xff] %v246_v11  ;;  %v296_v25 = vmul.f32 %v1365_v23, %v1364_v22  ;;  %v1367_v26 = vld [vmem:[%s2828_s0 + $0x270] sm:$0xff]  ;;  %1363 = vst [vmem:[%s2830_s2 + $0x70] sm:$0xff] %v286_v24 }
  0x1e   :  { %v1356_v14 = vld [vmem:[%s2829_s1 + $0x260] sm:$0xff]  ;;  %v1368_v27 = vld [vmem:[%s2829_s1 + $0x270] sm:$0xff] }
  0x1f   :  { %v266_v16 = vmul.f32 %v1356_v14, %v1355_v13  ;;  %v1358_v17 = vld [vmem:[%s2828_s0 + $0x360] sm:$0xff]  ;;  %1354 = vst [vmem:[%s2830_s2 + $0x160] sm:$0xff] %v256_v15  ;;  %v1370_v28 = vld [vmem:[%s2828_s0 + $0x370] sm:$0xff]  ;;  %v306_v29 = vmul.f32 %v1368_v27, %v1367_v26  ;;  %1366 = vst [vmem:[%s2830_s2 + $0x170] sm:$0xff] %v296_v25 }
  0x20   :  { %v1359_v18 = vld [vmem:[%s2829_s1 + $0x360] sm:$0xff]  ;;  %v1371_v30 = vld [vmem:[%s2829_s1 + $0x370] sm:$0xff] }
  0x21   :  { %v276_v20 = vmul.f32 %v1359_v18, %v1358_v17  ;;  %1357 = vst [vmem:[%s2830_s2 + $0x260] sm:$0xff] %v266_v16  ;;  %v1373_v31 = vld [vmem:[%s2828_s0 + $0x80] sm:$0xff]  ;;  %v316_v33 = vmul.f32 %v1371_v30, %v1370_v28  ;;  %1369 = vst [vmem:[%s2830_s2 + $0x270] sm:$0xff] %v306_v29  ;;  %v1385_v44 = vld [vmem:[%s2828_s0 + $0x90] sm:$0xff] }
  0x22   :  { %v1374_v32 = vld [vmem:[%s2829_s1 + $0x80] sm:$0xff]  ;;  %v1386_v45 = vld [vmem:[%s2829_s1 + $0x90] sm:$0xff] }
  0x23   :  { %1360 = vst [vmem:[%s2830_s2 + $0x360] sm:$0xff] %v276_v20  ;;  %v326_v34 = vmul.f32 %v1374_v32, %v1373_v31  ;;  %v1376_v35 = vld [vmem:[%s2828_s0 + $0x180] sm:$0xff]  ;;  %1372 = vst [vmem:[%s2830_s2 + $0x370] sm:$0xff] %v316_v33  ;;  %v1388_v46 = vld [vmem:[%s2828_s0 + $0x190] sm:$0xff]  ;;  %v366_v47 = vmul.f32 %v1386_v45, %v1385_v44 }
  0x24   :  { %v1377_v36 = vld [vmem:[%s2829_s1 + $0x180] sm:$0xff]  ;;  %v1389_v48 = vld [vmem:[%s2829_s1 + $0x190] sm:$0xff] }
  0x25   :  { %v1379_v37 = vld [vmem:[%s2828_s0 + $0x280] sm:$0xff]  ;;  %v336_v38 = vmul.f32 %v1377_v36, %v1376_v35  ;;  %1375 = vst [vmem:[%s2830_s2 + $0x80] sm:$0xff] %v326_v34  ;;  %v1391_v49 = vld [vmem:[%s2828_s0 + $0x290] sm:$0xff]  ;;  %v376_v51 = vmul.f32 %v1389_v48, %v1388_v46  ;;  %1387 = vst [vmem:[%s2830_s2 + $0x90] sm:$0xff] %v366_v47 }
  0x26   :  { %v1380_v39 = vld [vmem:[%s2829_s1 + $0x280] sm:$0xff]  ;;  %v1392_v50 = vld [vmem:[%s2829_s1 + $0x290] sm:$0xff] }
  0x27   :  { %v1382_v40 = vld [vmem:[%s2828_s0 + $0x380] sm:$0xff]  ;;  %v346_v42 = vmul.f32 %v1380_v39, %v1379_v37  ;;  %1378 = vst [vmem:[%s2830_s2 + $0x180] sm:$0xff] %v336_v38  ;;  %v386_v52 = vmul.f32 %v1392_v50, %v1391_v49  ;;  %v1394_v53 = vld [vmem:[%s2828_s0 + $0x390] sm:$0xff]  ;;  %1390 = vst [vmem:[%s2830_s2 + $0x190] sm:$0xff] %v376_v51 }
  0x28   :  { %v1383_v41 = vld [vmem:[%s2829_s1 + $0x380] sm:$0xff]  ;;  %v1395_v54 = vld [vmem:[%s2829_s1 + $0x390] sm:$0xff] }
  0x29   :  { %v356_v43 = vmul.f32 %v1383_v41, %v1382_v40  ;;  %1381 = vst [vmem:[%s2830_s2 + $0x280] sm:$0xff] %v346_v42  ;;  %v1397_v55 = vld [vmem:[%s2828_s0 + $0xa0] sm:$0xff]  ;;  %v396_v56 = vmul.f32 %v1395_v54, %v1394_v53  ;;  %1393 = vst [vmem:[%s2830_s2 + $0x290] sm:$0xff] %v386_v52  ;;  %v1409_v3 = vld [vmem:[%s2828_s0 + $0xb0] sm:$0xff] }
  0x2a   :  { %v1398_v57 = vld [vmem:[%s2829_s1 + $0xa0] sm:$0xff]  ;;  %v1410_v4 = vld [vmem:[%s2829_s1 + $0xb0] sm:$0xff] }
  0x2b   :  { %1384 = vst [vmem:[%s2830_s2 + $0x380] sm:$0xff] %v356_v43  ;;  %v1400_v58 = vld [vmem:[%s2828_s0 + $0x1a0] sm:$0xff]  ;;  %v406_v60 = vmul.f32 %v1398_v57, %v1397_v55  ;;  %1396 = vst [vmem:[%s2830_s2 + $0x390] sm:$0xff] %v396_v56  ;;  %v446_v6 = vmul.f32 %v1410_v4, %v1409_v3  ;;  %v1412_v7 = vld [vmem:[%s2828_s0 + $0x1b0] sm:$0xff] }
  0x2c   :  { %v1401_v59 = vld [vmem:[%s2829_s1 + $0x1a0] sm:$0xff]  ;;  %v1413_v8 = vld [vmem:[%s2829_s1 + $0x1b0] sm:$0xff]  ;;  %v1473_v3 = vld [vmem:[%s2829_s1 + $0x108] sm:$0xff] }
  0x2d   :  { %v416_v61 = vmul.f32 %v1401_v59, %v1400_v58  ;;  %v1403_v62 = vld [vmem:[%s2828_s0 + $0x2a0] sm:$0xff]  ;;  %1399 = vst [vmem:[%s2830_s2 + $0xa0] sm:$0xff] %v406_v60  ;;  %v1415_v9 = vld [vmem:[%s2828_s0 + $0x2b0] sm:$0xff]  ;;  %v456_v10 = vmul.f32 %v1413_v8, %v1412_v7  ;;  %1411 = vst [vmem:[%s2830_s2 + $0xb0] sm:$0xff] %v446_v6 }
  0x2e   :  { %v1404_v63 = vld [vmem:[%s2829_s1 + $0x2a0] sm:$0xff]  ;;  %v1416_v11 = vld [vmem:[%s2829_s1 + $0x2b0] sm:$0xff]  ;;  %v1475_v6 = vld [vmem:[%s2828_s0 + $0x208] sm:$0xff] }
  0x2f   :  { %v1406_v0 = vld [vmem:[%s2828_s0 + $0x3a0] sm:$0xff]  ;;  %v426_v1 = vmul.f32 %v1404_v63, %v1403_v62  ;;  %1402 = vst [vmem:[%s2830_s2 + $0x1a0] sm:$0xff] %v416_v61  ;;  %v1418_v12 = vld [vmem:[%s2828_s0 + $0x3b0] sm:$0xff]  ;;  %v466_v14 = vmul.f32 %v1416_v11, %v1415_v9  ;;  %1414 = vst [vmem:[%s2830_s2 + $0x1b0] sm:$0xff] %v456_v10 }
  0x30   :  { %v1407_v2 = vld [vmem:[%s2829_s1 + $0x3a0] sm:$0xff]  ;;  %v1419_v13 = vld [vmem:[%s2829_s1 + $0x3b0] sm:$0xff]  ;;  %v1469_v63 = vld [vmem:[%s2828_s0 + $0x8] sm:$0xff] }
  0x31   :  { %v436_v5 = vmul.f32 %v1407_v2, %v1406_v0  ;;  %1405 = vst [vmem:[%s2830_s2 + $0x2a0] sm:$0xff] %v426_v1  ;;  %v476_v15 = vmul.f32 %v1419_v13, %v1418_v12  ;;  %v1421_v16 = vld [vmem:[%s2828_s0 + $0xc0] sm:$0xff]  ;;  %1417 = vst [vmem:[%s2830_s2 + $0x2b0] sm:$0xff] %v466_v14  ;;  %v1433_v27 = vld [vmem:[%s2828_s0 + $0xd0] sm:$0xff] }
  0x32   :  { %v1422_v17 = vld [vmem:[%s2829_s1 + $0xc0] sm:$0xff]  ;;  %v1434_v29 = vld [vmem:[%s2829_s1 + $0xd0] sm:$0xff]  ;;  %v1470_v1 = vld [vmem:[%s2829_s1 + $0x8] sm:$0xff] }
  0x33   :  { %1408 = vst [vmem:[%s2830_s2 + $0x3a0] sm:$0xff] %v436_v5  ;;  %v1424_v18 = vld [vmem:[%s2828_s0 + $0x1c0] sm:$0xff]  ;;  %v486_v19 = vmul.f32 %v1422_v17, %v1421_v16  ;;  %1420 = vst [vmem:[%s2830_s2 + $0x3b0] sm:$0xff] %v476_v15  ;;  %v1436_v30 = vld [vmem:[%s2828_s0 + $0x1d0] sm:$0xff]  ;;  %v526_v32 = vmul.f32 %v1434_v29, %v1433_v27  ;;  %v646_v4 = vmul.f32 %v1470_v1, %v1469_v63 }
  0x34   :  { %v1425_v20 = vld [vmem:[%s2829_s1 + $0x1c0] sm:$0xff]  ;;  %v1437_v31 = vld [vmem:[%s2829_s1 + $0x1d0] sm:$0xff]  ;;  %v1472_v2 = vld [vmem:[%s2828_s0 + $0x108] sm:$0xff] }
  0x35   :  { %v1427_v21 = vld [vmem:[%s2828_s0 + $0x2c0] sm:$0xff]  ;;  %v496_v23 = vmul.f32 %v1425_v20, %v1424_v18  ;;  %1423 = vst [vmem:[%s2830_s2 + $0xc0] sm:$0xff] %v486_v19  ;;  %v536_v33 = vmul.f32 %v1437_v31, %v1436_v30  ;;  %v1439_v34 = vld [vmem:[%s2828_s0 + $0x2d0] sm:$0xff]  ;;  %1435 = vst [vmem:[%s2830_s2 + $0xd0] sm:$0xff] %v526_v32  ;;  %v656_v5 = vmul.f32 %v1473_v3, %v1472_v2 }
  0x36   :  { %v1428_v22 = vld [vmem:[%s2829_s1 + $0x2c0] sm:$0xff]  ;;  %v1440_v35 = vld [vmem:[%s2829_s1 + $0x2d0] sm:$0xff]  ;;  %v1476_v7 = vld [vmem:[%s2829_s1 + $0x208] sm:$0xff]  ;;  %1471 = vst [vmem:[%s2830_s2 + $0x8] sm:$0xff] %v646_v4 }
  0x37   :  { %v506_v24 = vmul.f32 %v1428_v22, %v1427_v21  ;;  %v1430_v25 = vld [vmem:[%s2828_s0 + $0x3c0] sm:$0xff]  ;;  %1426 = vst [vmem:[%s2830_s2 + $0x1c0] sm:$0xff] %v496_v23  ;;  %v1442_v36 = vld [vmem:[%s2828_s0 + $0x3d0] sm:$0xff]  ;;  %v546_v37 = vmul.f32 %v1440_v35, %v1439_v34  ;;  %1438 = vst [vmem:[%s2830_s2 + $0x1d0] sm:$0xff] %v536_v33  ;;  %v666_v9 = vmul.f32 %v1476_v7, %v1475_v6 }
  0x38   :  { %v1431_v26 = vld [vmem:[%s2829_s1 + $0x3c0] sm:$0xff]  ;;  %v1443_v38 = vld [vmem:[%s2829_s1 + $0x3d0] sm:$0xff]  ;;  %v1478_v8 = vld [vmem:[%s2828_s0 + $0x308] sm:$0xff]  ;;  %1474 = vst [vmem:[%s2830_s2 + $0x108] sm:$0xff] %v656_v5 }
  0x39   :  { %v516_v28 = vmul.f32 %v1431_v26, %v1430_v25  ;;  %1429 = vst [vmem:[%s2830_s2 + $0x2c0] sm:$0xff] %v506_v24  ;;  %v1445_v39 = vld [vmem:[%s2828_s0 + $0xe0] sm:$0xff]  ;;  %v556_v41 = vmul.f32 %v1443_v38, %v1442_v36  ;;  %1441 = vst [vmem:[%s2830_s2 + $0x2d0] sm:$0xff] %v546_v37  ;;  %v1457_v52 = vld [vmem:[%s2828_s0 + $0xf0] sm:$0xff] }
  0x3a   :  { %v1446_v40 = vld [vmem:[%s2829_s1 + $0xe0] sm:$0xff]  ;;  %v1458_v53 = vld [vmem:[%s2829_s1 + $0xf0] sm:$0xff]  ;;  %v1479_v10 = vld [vmem:[%s2829_s1 + $0x308] sm:$0xff]  ;;  %1477 = vst [vmem:[%s2830_s2 + $0x208] sm:$0xff] %v666_v9 }
  0x3b   :  { %1432 = vst [vmem:[%s2830_s2 + $0x3c0] sm:$0xff] %v516_v28  ;;  %v566_v42 = vmul.f32 %v1446_v40, %v1445_v39  ;;  %v1448_v43 = vld [vmem:[%s2828_s0 + $0x1e0] sm:$0xff]  ;;  %1444 = vst [vmem:[%s2830_s2 + $0x3d0] sm:$0xff] %v556_v41  ;;  %v1460_v54 = vld [vmem:[%s2828_s0 + $0x1f0] sm:$0xff]  ;;  %v606_v55 = vmul.f32 %v1458_v53, %v1457_v52  ;;  %v676_v13 = vmul.f32 %v1479_v10, %v1478_v8 }
  0x3c   :  { %v1449_v44 = vld [vmem:[%s2829_s1 + $0x1e0] sm:$0xff]  ;;  %v1461_v56 = vld [vmem:[%s2829_s1 + $0x1f0] sm:$0xff]  ;;  %v1481_v11 = vld [vmem:[%s2828_s0 + $0x18] sm:$0xff] }
  0x3d   :  { %v1451_v45 = vld [vmem:[%s2828_s0 + $0x2e0] sm:$0xff]  ;;  %v576_v46 = vmul.f32 %v1449_v44, %v1448_v43  ;;  %1447 = vst [vmem:[%s2830_s2 + $0xe0] sm:$0xff] %v566_v42  ;;  %v1463_v57 = vld [vmem:[%s2828_s0 + $0x2f0] sm:$0xff]  ;;  %v616_v59 = vmul.f32 %v1461_v56, %v1460_v54  ;;  %1459 = vst [vmem:[%s2830_s2 + $0xf0] sm:$0xff] %v606_v55 }
  0x3e   :  { %v1452_v47 = vld [vmem:[%s2829_s1 + $0x2e0] sm:$0xff]  ;;  %v1464_v58 = vld [vmem:[%s2829_s1 + $0x2f0] sm:$0xff]  ;;  %v1482_v12 = vld [vmem:[%s2829_s1 + $0x18] sm:$0xff]  ;;  %1480 = vst [vmem:[%s2830_s2 + $0x308] sm:$0xff] %v676_v13 }
  0x3f   :  { %v1454_v48 = vld [vmem:[%s2828_s0 + $0x3e0] sm:$0xff]  ;;  %v586_v50 = vmul.f32 %v1452_v47, %v1451_v45  ;;  %1450 = vst [vmem:[%s2830_s2 + $0x1e0] sm:$0xff] %v576_v46  ;;  %v626_v60 = vmul.f32 %v1464_v58, %v1463_v57  ;;  %v1466_v61 = vld [vmem:[%s2828_s0 + $0x3f0] sm:$0xff]  ;;  %1462 = vst [vmem:[%s2830_s2 + $0x1f0] sm:$0xff] %v616_v59  ;;  %v686_v14 = vmul.f32 %v1482_v12, %v1481_v11 }
  0x40   :  { %v1455_v49 = vld [vmem:[%s2829_s1 + $0x3e0] sm:$0xff]  ;;  %v1467_v62 = vld [vmem:[%s2829_s1 + $0x3f0] sm:$0xff]  ;;  %v1484_v15 = vld [vmem:[%s2828_s0 + $0x118] sm:$0xff] }
  0x41   :  { %v596_v51 = vmul.f32 %v1455_v49, %v1454_v48  ;;  %1453 = vst [vmem:[%s2830_s2 + $0x2e0] sm:$0xff] %v586_v50  ;;  %v636_v0 = vmul.f32 %v1467_v62, %v1466_v61  ;;  %1465 = vst [vmem:[%s2830_s2 + $0x2f0] sm:$0xff] %v626_v60  ;;  %v1485_v16 = vld [vmem:[%s2829_s1 + $0x118] sm:$0xff]  ;;  %v1493_v24 = vld [vmem:[%s2828_s0 + $0x28] sm:$0xff] }
  0x42   :  { %v1487_v17 = vld [vmem:[%s2828_s0 + $0x218] sm:$0xff]  ;;  %v696_v18 = vmul.f32 %v1485_v16, %v1484_v15  ;;  %1483 = vst [vmem:[%s2830_s2 + $0x18] sm:$0xff] %v686_v14  ;;  %v1494_v25 = vld [vmem:[%s2829_s1 + $0x28] sm:$0xff] }
  0x43   :  { %1456 = vst [vmem:[%s2830_s2 + $0x3e0] sm:$0xff] %v596_v51  ;;  %1468 = vst [vmem:[%s2830_s2 + $0x3f0] sm:$0xff] %v636_v0  ;;  %v1488_v19 = vld [vmem:[%s2829_s1 + $0x218] sm:$0xff]  ;;  %v1496_v26 = vld [vmem:[%s2828_s0 + $0x128] sm:$0xff]  ;;  %v726_v27 = vmul.f32 %v1494_v25, %v1493_v24 }
  0x44   :  { %v1490_v20 = vld [vmem:[%s2828_s0 + $0x318] sm:$0xff]  ;;  %v706_v22 = vmul.f32 %v1488_v19, %v1487_v17  ;;  %1486 = vst [vmem:[%s2830_s2 + $0x118] sm:$0xff] %v696_v18  ;;  %v1497_v28 = vld [vmem:[%s2829_s1 + $0x128] sm:$0xff] }
  0x45   :  { %v1491_v21 = vld [vmem:[%s2829_s1 + $0x318] sm:$0xff]  ;;  %v1499_v29 = vld [vmem:[%s2828_s0 + $0x228] sm:$0xff]  ;;  %v736_v31 = vmul.f32 %v1497_v28, %v1496_v26  ;;  %1495 = vst [vmem:[%s2830_s2 + $0x28] sm:$0xff] %v726_v27 }
  0x46   :  { %v716_v23 = vmul.f32 %v1491_v21, %v1490_v20  ;;  %v1500_v30 = vld [vmem:[%s2829_s1 + $0x228] sm:$0xff]  ;;  %1489 = vst [vmem:[%s2830_s2 + $0x218] sm:$0xff] %v706_v22  ;;  %v1505_v35 = vld [vmem:[%s2828_s0 + $0x38] sm:$0xff] }
  0x47   :  { %v746_v32 = vmul.f32 %v1500_v30, %v1499_v29  ;;  %v1502_v33 = vld [vmem:[%s2828_s0 + $0x328] sm:$0xff]  ;;  %v1506_v37 = vld [vmem:[%s2829_s1 + $0x38] sm:$0xff]  ;;  %1498 = vst [vmem:[%s2830_s2 + $0x128] sm:$0xff] %v736_v31 }
  0x48   :  { %1492 = vst [vmem:[%s2830_s2 + $0x318] sm:$0xff] %v716_v23  ;;  %v1503_v34 = vld [vmem:[%s2829_s1 + $0x328] sm:$0xff]  ;;  %v1508_v38 = vld [vmem:[%s2828_s0 + $0x138] sm:$0xff]  ;;  %v766_v40 = vmul.f32 %v1506_v37, %v1505_v35 }
  0x49   :  { %v756_v36 = vmul.f32 %v1503_v34, %v1502_v33  ;;  %v1509_v39 = vld [vmem:[%s2829_s1 + $0x138] sm:$0xff]  ;;  %1501 = vst [vmem:[%s2830_s2 + $0x228] sm:$0xff] %v746_v32  ;;  %v1517_v47 = vld [vmem:[%s2828_s0 + $0x48] sm:$0xff] }
  0x4a   :  { %v776_v41 = vmul.f32 %v1509_v39, %v1508_v38  ;;  %v1511_v42 = vld [vmem:[%s2828_s0 + $0x238] sm:$0xff]  ;;  %v1518_v48 = vld [vmem:[%s2829_s1 + $0x48] sm:$0xff]  ;;  %1507 = vst [vmem:[%s2830_s2 + $0x38] sm:$0xff] %v766_v40 }
  0x4b   :  { %v1512_v43 = vld [vmem:[%s2829_s1 + $0x238] sm:$0xff]  ;;  %1504 = vst [vmem:[%s2830_s2 + $0x328] sm:$0xff] %v756_v36  ;;  %v806_v50 = vmul.f32 %v1518_v48, %v1517_v47  ;;  %v1520_v51 = vld [vmem:[%s2828_s0 + $0x148] sm:$0xff] }
  0x4c   :  { %v1514_v44 = vld [vmem:[%s2828_s0 + $0x338] sm:$0xff]  ;;  %v786_v45 = vmul.f32 %v1512_v43, %v1511_v42  ;;  %1510 = vst [vmem:[%s2830_s2 + $0x138] sm:$0xff] %v776_v41  ;;  %v1521_v52 = vld [vmem:[%s2829_s1 + $0x148] sm:$0xff] }
  0x4d   :  { %v1515_v46 = vld [vmem:[%s2829_s1 + $0x338] sm:$0xff]  ;;  %v1523_v53 = vld [vmem:[%s2828_s0 + $0x248] sm:$0xff]  ;;  %v816_v54 = vmul.f32 %v1521_v52, %v1520_v51  ;;  %1519 = vst [vmem:[%s2830_s2 + $0x48] sm:$0xff] %v806_v50 }
  0x4e   :  { %v796_v49 = vmul.f32 %v1515_v46, %v1514_v44  ;;  %1513 = vst [vmem:[%s2830_s2 + $0x238] sm:$0xff] %v786_v45  ;;  %v1524_v55 = vld [vmem:[%s2829_s1 + $0x248] sm:$0xff]  ;;  %v1529_v60 = vld [vmem:[%s2828_s0 + $0x58] sm:$0xff] }
  0x4f   :  { %v1526_v56 = vld [vmem:[%s2828_s0 + $0x348] sm:$0xff]  ;;  %v826_v58 = vmul.f32 %v1524_v55, %v1523_v53  ;;  %v1530_v61 = vld [vmem:[%s2829_s1 + $0x58] sm:$0xff]  ;;  %1522 = vst [vmem:[%s2830_s2 + $0x148] sm:$0xff] %v816_v54 }
  0x50   :  { %v1527_v57 = vld [vmem:[%s2829_s1 + $0x348] sm:$0xff]  ;;  %1516 = vst [vmem:[%s2830_s2 + $0x338] sm:$0xff] %v796_v49  ;;  %v1532_v62 = vld [vmem:[%s2828_s0 + $0x158] sm:$0xff]  ;;  %v846_v63 = vmul.f32 %v1530_v61, %v1529_v60 }
  0x51   :  { %v836_v59 = vmul.f32 %v1527_v57, %v1526_v56  ;;  %v1533_v0 = vld [vmem:[%s2829_s1 + $0x158] sm:$0xff]  ;;  %1525 = vst [vmem:[%s2830_s2 + $0x248] sm:$0xff] %v826_v58  ;;  %v1541_v7 = vld [vmem:[%s2828_s0 + $0x68] sm:$0xff] }
  0x52   :  { %v1535_v1 = vld [vmem:[%s2828_s0 + $0x258] sm:$0xff]  ;;  %v856_v3 = vmul.f32 %v1533_v0, %v1532_v62  ;;  %1531 = vst [vmem:[%s2830_s2 + $0x58] sm:$0xff] %v846_v63  ;;  %v1542_v9 = vld [vmem:[%s2829_s1 + $0x68] sm:$0xff] }
  0x53   :  { %v1536_v2 = vld [vmem:[%s2829_s1 + $0x258] sm:$0xff]  ;;  %1528 = vst [vmem:[%s2830_s2 + $0x348] sm:$0xff] %v836_v59  ;;  %v1544_v10 = vld [vmem:[%s2828_s0 + $0x168] sm:$0xff]  ;;  %v886_v12 = vmul.f32 %v1542_v9, %v1541_v7 }
  0x54   :  { %v866_v4 = vmul.f32 %v1536_v2, %v1535_v1  ;;  %v1538_v5 = vld [vmem:[%s2828_s0 + $0x358] sm:$0xff]  ;;  %v1545_v11 = vld [vmem:[%s2829_s1 + $0x168] sm:$0xff]  ;;  %1534 = vst [vmem:[%s2830_s2 + $0x158] sm:$0xff] %v856_v3 }
  0x55   :  { %v1539_v6 = vld [vmem:[%s2829_s1 + $0x358] sm:$0xff]  ;;  %v896_v13 = vmul.f32 %v1545_v11, %v1544_v10  ;;  %v1547_v14 = vld [vmem:[%s2828_s0 + $0x268] sm:$0xff]  ;;  %1543 = vst [vmem:[%s2830_s2 + $0x68] sm:$0xff] %v886_v12 }
  0x56   :  { %v876_v8 = vmul.f32 %v1539_v6, %v1538_v5  ;;  %1537 = vst [vmem:[%s2830_s2 + $0x258] sm:$0xff] %v866_v4  ;;  %v1548_v15 = vld [vmem:[%s2829_s1 + $0x268] sm:$0xff]  ;;  %v1553_v19 = vld [vmem:[%s2828_s0 + $0x78] sm:$0xff] }
  0x57   :  { %v1550_v16 = vld [vmem:[%s2828_s0 + $0x368] sm:$0xff]  ;;  %v906_v17 = vmul.f32 %v1548_v15, %v1547_v14  ;;  %v1554_v20 = vld [vmem:[%s2829_s1 + $0x78] sm:$0xff]  ;;  %1546 = vst [vmem:[%s2830_s2 + $0x168] sm:$0xff] %v896_v13 }
  0x58   :  { %1540 = vst [vmem:[%s2830_s2 + $0x358] sm:$0xff] %v876_v8  ;;  %v1551_v18 = vld [vmem:[%s2829_s1 + $0x368] sm:$0xff]  ;;  %v926_v22 = vmul.f32 %v1554_v20, %v1553_v19  ;;  %v1556_v23 = vld [vmem:[%s2828_s0 + $0x178] sm:$0xff] }
  0x59   :  { %v916_v21 = vmul.f32 %v1551_v18, %v1550_v16  ;;  %v1557_v24 = vld [vmem:[%s2829_s1 + $0x178] sm:$0xff]  ;;  %1549 = vst [vmem:[%s2830_s2 + $0x268] sm:$0xff] %v906_v17  ;;  %v1565_v32 = vld [vmem:[%s2828_s0 + $0x88] sm:$0xff] }
  0x5a   :  { %v1559_v25 = vld [vmem:[%s2828_s0 + $0x278] sm:$0xff]  ;;  %v936_v26 = vmul.f32 %v1557_v24, %v1556_v23  ;;  %1555 = vst [vmem:[%s2830_s2 + $0x78] sm:$0xff] %v926_v22  ;;  %v1566_v33 = vld [vmem:[%s2829_s1 + $0x88] sm:$0xff] }
  0x5b   :  { %v1560_v27 = vld [vmem:[%s2829_s1 + $0x278] sm:$0xff]  ;;  %1552 = vst [vmem:[%s2830_s2 + $0x368] sm:$0xff] %v916_v21  ;;  %v1568_v34 = vld [vmem:[%s2828_s0 + $0x188] sm:$0xff]  ;;  %v966_v35 = vmul.f32 %v1566_v33, %v1565_v32 }
  0x5c   :  { %v1562_v28 = vld [vmem:[%s2828_s0 + $0x378] sm:$0xff]  ;;  %v946_v30 = vmul.f32 %v1560_v27, %v1559_v25  ;;  %1558 = vst [vmem:[%s2830_s2 + $0x178] sm:$0xff] %v936_v26  ;;  %v1569_v36 = vld [vmem:[%s2829_s1 + $0x188] sm:$0xff] }
  0x5d   :  { %v1563_v29 = vld [vmem:[%s2829_s1 + $0x378] sm:$0xff]  ;;  %v1571_v37 = vld [vmem:[%s2828_s0 + $0x288] sm:$0xff]  ;;  %v976_v39 = vmul.f32 %v1569_v36, %v1568_v34  ;;  %1567 = vst [vmem:[%s2830_s2 + $0x88] sm:$0xff] %v966_v35 }
  0x5e   :  { %v956_v31 = vmul.f32 %v1563_v29, %v1562_v28  ;;  %v1572_v38 = vld [vmem:[%s2829_s1 + $0x288] sm:$0xff]  ;;  %1561 = vst [vmem:[%s2830_s2 + $0x278] sm:$0xff] %v946_v30  ;;  %v1577_v43 = vld [vmem:[%s2828_s0 + $0x98] sm:$0xff] }
  0x5f   :  { %v986_v40 = vmul.f32 %v1572_v38, %v1571_v37  ;;  %v1574_v41 = vld [vmem:[%s2828_s0 + $0x388] sm:$0xff]  ;;  %v1578_v45 = vld [vmem:[%s2829_s1 + $0x98] sm:$0xff]  ;;  %1570 = vst [vmem:[%s2830_s2 + $0x188] sm:$0xff] %v976_v39 }
  0x60   :  { %1564 = vst [vmem:[%s2830_s2 + $0x378] sm:$0xff] %v956_v31  ;;  %v1575_v42 = vld [vmem:[%s2829_s1 + $0x388] sm:$0xff]  ;;  %v1580_v46 = vld [vmem:[%s2828_s0 + $0x198] sm:$0xff]  ;;  %v1006_v48 = vmul.f32 %v1578_v45, %v1577_v43 }
  0x61   :  { %v996_v44 = vmul.f32 %v1575_v42, %v1574_v41  ;;  %v1581_v47 = vld [vmem:[%s2829_s1 + $0x198] sm:$0xff]  ;;  %1573 = vst [vmem:[%s2830_s2 + $0x288] sm:$0xff] %v986_v40  ;;  %v1589_v55 = vld [vmem:[%s2828_s0 + $0xa8] sm:$0xff] }
  0x62   :  { %v1016_v49 = vmul.f32 %v1581_v47, %v1580_v46  ;;  %v1583_v50 = vld [vmem:[%s2828_s0 + $0x298] sm:$0xff]  ;;  %v1590_v56 = vld [vmem:[%s2829_s1 + $0xa8] sm:$0xff]  ;;  %1579 = vst [vmem:[%s2830_s2 + $0x98] sm:$0xff] %v1006_v48 }
  0x63   :  { %v1584_v51 = vld [vmem:[%s2829_s1 + $0x298] sm:$0xff]  ;;  %1576 = vst [vmem:[%s2830_s2 + $0x388] sm:$0xff] %v996_v44  ;;  %v1046_v58 = vmul.f32 %v1590_v56, %v1589_v55  ;;  %v1592_v59 = vld [vmem:[%s2828_s0 + $0x1a8] sm:$0xff] }
  0x64   :  { %v1586_v52 = vld [vmem:[%s2828_s0 + $0x398] sm:$0xff]  ;;  %v1026_v53 = vmul.f32 %v1584_v51, %v1583_v50  ;;  %1582 = vst [vmem:[%s2830_s2 + $0x198] sm:$0xff] %v1016_v49  ;;  %v1593_v60 = vld [vmem:[%s2829_s1 + $0x1a8] sm:$0xff] }
  0x65   :  { %v1587_v54 = vld [vmem:[%s2829_s1 + $0x398] sm:$0xff]  ;;  %v1595_v61 = vld [vmem:[%s2828_s0 + $0x2a8] sm:$0xff]  ;;  %v1056_v62 = vmul.f32 %v1593_v60, %v1592_v59  ;;  %1591 = vst [vmem:[%s2830_s2 + $0xa8] sm:$0xff] %v1046_v58 }
  0x66   :  { %v1036_v57 = vmul.f32 %v1587_v54, %v1586_v52  ;;  %1585 = vst [vmem:[%s2830_s2 + $0x298] sm:$0xff] %v1026_v53  ;;  %v1596_v63 = vld [vmem:[%s2829_s1 + $0x2a8] sm:$0xff]  ;;  %v1601_v4 = vld [vmem:[%s2828_s0 + $0xb8] sm:$0xff] }
  0x67   :  { %v1598_v0 = vld [vmem:[%s2828_s0 + $0x3a8] sm:$0xff]  ;;  %v1066_v2 = vmul.f32 %v1596_v63, %v1595_v61  ;;  %v1602_v5 = vld [vmem:[%s2829_s1 + $0xb8] sm:$0xff]  ;;  %1594 = vst [vmem:[%s2830_s2 + $0x1a8] sm:$0xff] %v1056_v62 }
  0x68   :  { %v1599_v1 = vld [vmem:[%s2829_s1 + $0x3a8] sm:$0xff]  ;;  %1588 = vst [vmem:[%s2830_s2 + $0x398] sm:$0xff] %v1036_v57  ;;  %v1604_v6 = vld [vmem:[%s2828_s0 + $0x1b8] sm:$0xff]  ;;  %v1086_v7 = vmul.f32 %v1602_v5, %v1601_v4 }
  0x69   :  { %v1076_v3 = vmul.f32 %v1599_v1, %v1598_v0  ;;  %v1605_v8 = vld [vmem:[%s2829_s1 + $0x1b8] sm:$0xff]  ;;  %1597 = vst [vmem:[%s2830_s2 + $0x2a8] sm:$0xff] %v1066_v2  ;;  %v1613_v15 = vld [vmem:[%s2828_s0 + $0xc8] sm:$0xff] }
  0x6a   :  { %v1607_v9 = vld [vmem:[%s2828_s0 + $0x2b8] sm:$0xff]  ;;  %v1096_v11 = vmul.f32 %v1605_v8, %v1604_v6  ;;  %1603 = vst [vmem:[%s2830_s2 + $0xb8] sm:$0xff] %v1086_v7  ;;  %v1614_v17 = vld [vmem:[%s2829_s1 + $0xc8] sm:$0xff] }
  0x6b   :  { %v1608_v10 = vld [vmem:[%s2829_s1 + $0x2b8] sm:$0xff]  ;;  %1600 = vst [vmem:[%s2830_s2 + $0x3a8] sm:$0xff] %v1076_v3  ;;  %v1616_v18 = vld [vmem:[%s2828_s0 + $0x1c8] sm:$0xff]  ;;  %v1126_v20 = vmul.f32 %v1614_v17, %v1613_v15 }
  0x6c   :  { %v1106_v12 = vmul.f32 %v1608_v10, %v1607_v9  ;;  %v1610_v13 = vld [vmem:[%s2828_s0 + $0x3b8] sm:$0xff]  ;;  %v1617_v19 = vld [vmem:[%s2829_s1 + $0x1c8] sm:$0xff]  ;;  %1606 = vst [vmem:[%s2830_s2 + $0x1b8] sm:$0xff] %v1096_v11 }
  0x6d   :  { %v1611_v14 = vld [vmem:[%s2829_s1 + $0x3b8] sm:$0xff]  ;;  %v1136_v21 = vmul.f32 %v1617_v19, %v1616_v18  ;;  %v1619_v22 = vld [vmem:[%s2828_s0 + $0x2c8] sm:$0xff]  ;;  %1615 = vst [vmem:[%s2830_s2 + $0xc8] sm:$0xff] %v1126_v20 }
  0x6e   :  { %v1116_v16 = vmul.f32 %v1611_v14, %v1610_v13  ;;  %1609 = vst [vmem:[%s2830_s2 + $0x2b8] sm:$0xff] %v1106_v12  ;;  %v1620_v23 = vld [vmem:[%s2829_s1 + $0x2c8] sm:$0xff]  ;;  %v1625_v27 = vld [vmem:[%s2828_s0 + $0xd8] sm:$0xff] }
  0x6f   :  { %v1622_v24 = vld [vmem:[%s2828_s0 + $0x3c8] sm:$0xff]  ;;  %v1146_v25 = vmul.f32 %v1620_v23, %v1619_v22  ;;  %v1626_v28 = vld [vmem:[%s2829_s1 + $0xd8] sm:$0xff]  ;;  %1618 = vst [vmem:[%s2830_s2 + $0x1c8] sm:$0xff] %v1136_v21 }
  0x70   :  { %1612 = vst [vmem:[%s2830_s2 + $0x3b8] sm:$0xff] %v1116_v16  ;;  %v1623_v26 = vld [vmem:[%s2829_s1 + $0x3c8] sm:$0xff]  ;;  %v1166_v30 = vmul.f32 %v1626_v28, %v1625_v27  ;;  %v1628_v31 = vld [vmem:[%s2828_s0 + $0x1d8] sm:$0xff] }
  0x71   :  { %v1156_v29 = vmul.f32 %v1623_v26, %v1622_v24  ;;  %v1629_v32 = vld [vmem:[%s2829_s1 + $0x1d8] sm:$0xff]  ;;  %1621 = vst [vmem:[%s2830_s2 + $0x2c8] sm:$0xff] %v1146_v25  ;;  %v1637_v40 = vld [vmem:[%s2828_s0 + $0xe8] sm:$0xff] }
  0x72   :  { %v1631_v33 = vld [vmem:[%s2828_s0 + $0x2d8] sm:$0xff]  ;;  %v1176_v34 = vmul.f32 %v1629_v32, %v1628_v31  ;;  %1627 = vst [vmem:[%s2830_s2 + $0xd8] sm:$0xff] %v1166_v30  ;;  %v1638_v41 = vld [vmem:[%s2829_s1 + $0xe8] sm:$0xff] }
  0x73   :  { %v1632_v35 = vld [vmem:[%s2829_s1 + $0x2d8] sm:$0xff]  ;;  %1624 = vst [vmem:[%s2830_s2 + $0x3c8] sm:$0xff] %v1156_v29  ;;  %v1640_v42 = vld [vmem:[%s2828_s0 + $0x1e8] sm:$0xff]  ;;  %v1206_v43 = vmul.f32 %v1638_v41, %v1637_v40 }
  0x74   :  { %v1634_v36 = vld [vmem:[%s2828_s0 + $0x3d8] sm:$0xff]  ;;  %v1186_v38 = vmul.f32 %v1632_v35, %v1631_v33  ;;  %1630 = vst [vmem:[%s2830_s2 + $0x1d8] sm:$0xff] %v1176_v34  ;;  %v1641_v44 = vld [vmem:[%s2829_s1 + $0x1e8] sm:$0xff] }
  0x75   :  { %v1635_v37 = vld [vmem:[%s2829_s1 + $0x3d8] sm:$0xff]  ;;  %v1643_v45 = vld [vmem:[%s2828_s0 + $0x2e8] sm:$0xff]  ;;  %v1216_v47 = vmul.f32 %v1641_v44, %v1640_v42  ;;  %1639 = vst [vmem:[%s2830_s2 + $0xe8] sm:$0xff] %v1206_v43 }
  0x76   :  { %v1196_v39 = vmul.f32 %v1635_v37, %v1634_v36  ;;  %v1644_v46 = vld [vmem:[%s2829_s1 + $0x2e8] sm:$0xff]  ;;  %1633 = vst [vmem:[%s2830_s2 + $0x2d8] sm:$0xff] %v1186_v38  ;;  %v1649_v51 = vld [vmem:[%s2828_s0 + $0xf8] sm:$0xff] }
  0x77   :  { %v1226_v48 = vmul.f32 %v1644_v46, %v1643_v45  ;;  %v1646_v49 = vld [vmem:[%s2828_s0 + $0x3e8] sm:$0xff]  ;;  %v1650_v53 = vld [vmem:[%s2829_s1 + $0xf8] sm:$0xff]  ;;  %1642 = vst [vmem:[%s2830_s2 + $0x1e8] sm:$0xff] %v1216_v47 }
  0x78   :  { %1636 = vst [vmem:[%s2830_s2 + $0x3d8] sm:$0xff] %v1196_v39  ;;  %v1647_v50 = vld [vmem:[%s2829_s1 + $0x3e8] sm:$0xff]  ;;  %v1652_v54 = vld [vmem:[%s2828_s0 + $0x1f8] sm:$0xff]  ;;  %v1246_v56 = vmul.f32 %v1650_v53, %v1649_v51 }
  0x79   :  { %v1236_v52 = vmul.f32 %v1647_v50, %v1646_v49  ;;  %v1653_v55 = vld [vmem:[%s2829_s1 + $0x1f8] sm:$0xff]  ;;  %1645 = vst [vmem:[%s2830_s2 + $0x2e8] sm:$0xff] %v1226_v48 }
  0x7a   :  { %v1256_v57 = vmul.f32 %v1653_v55, %v1652_v54  ;;  %v1655_v58 = vld [vmem:[%s2828_s0 + $0x2f8] sm:$0xff]  ;;  %1651 = vst [vmem:[%s2830_s2 + $0xf8] sm:$0xff] %v1246_v56 }
  0x7b   :  { %v1656_v59 = vld [vmem:[%s2829_s1 + $0x2f8] sm:$0xff]  ;;  %1648 = vst [vmem:[%s2830_s2 + $0x3e8] sm:$0xff] %v1236_v52 }
  0x7c   :  { %v1658_v60 = vld [vmem:[%s2828_s0 + $0x3f8] sm:$0xff]  ;;  %v1266_v61 = vmul.f32 %v1656_v59, %v1655_v58  ;;  %1654 = vst [vmem:[%s2830_s2 + $0x1f8] sm:$0xff] %v1256_v57 }
  0x7d   :  { %v1659_v62 = vld [vmem:[%s2829_s1 + $0x3f8] sm:$0xff] }
  0x7e   :  { %v1276_v63 = vmul.f32 %v1659_v62, %v1658_v60  ;;  %1657 = vst [vmem:[%s2830_s2 + $0x2f8] sm:$0xff] %v1266_v61 }
  0x80   :  { %1660 = vst [vmem:[%s2830_s2 + $0x3f8] sm:$0xff] %v1276_v63 }

// kernel: forward.1
= control target key start
LH: loop header
LB: loop body
LE: loop exit
PB: predicated region body
PF: predicated region fallthrough
CT: control target
= control target key end

     0   :  { %s986_s15 = smov 0   ;;  %s1160_s0 = inlined_call_operand.vmem [shape: bf16[256,256], index: 0, kind: input, shape index: {}]   ;;  %s1161_s1 = inlined_call_operand.vmem [shape: bf16[256,256], index: 1, kind: input, shape index: {}]   ;;  %s1162_s2 = inlined_call_operand.vmem [shape: bf16[256,128], index: 2, kind: input, shape index: {}]   ;;  %s1163_s3 = inlined_call_operand.vmem [shape: f32[1,128], index: 3, kind: input, shape index: {}]   ;;  %s1164_s4 = inlined_call_operand.vmem [shape: bf16[256,128], index: 4, kind: output, shape index: {}]  }
   0x1 LB: > { %s762_s16 = sadd.s32 4294967295, %s959_s15   ;;  %p766_p0 = scmp.ge.s32.totalorder %s959_s15, 1  ;;  %s959_s15 = sphi %s986_s15, %s14_s15  }
   0x2   : > { %p164_p1 = scmp.lt.s32.totalorder %s959_s15, 9 }
   0x4   : > { %p165_p2 = pnand %p766_p0, %p164_p1 }
   0x5   : > { %s767_s27 = sshll.u32 (!%p165_p2), %s762_s16, 2 }
   0x6   : > { %168 = sbr.rel (%p165_p2) target bundleno = 495 (0x1ef), region = 36  ;;  %p192_p3 = scmp.lt.s32.totalorder (!%p165_p2), %s767_s27, 31 }
   0xb   : > { %v883_v0 = vld [vmem:[%s1161_s1 + $0x74] ss:$8 sps:$4 sm:$0xff]   ;;  %v885_v1 = vld [vmem:[%s1161_s1 + $0x70] ss:$8 sps:$4 sm:$0xff]   ;;  %v886_v2 = vld [vmem:[%s1161_s1 + $0x64] ss:$8 sps:$4 sm:$0xff]  }
   0xc   : > { %421 = vmatprep.subr.bf16.mxu0 %v883_v0  ;;  %v888_v3 = vld [vmem:[%s1161_s1 + $0x60] ss:$8 sps:$4 sm:$0xff]   ;;  %v889_v4 = vld [vmem:[%s1161_s1 + $0x54] ss:$8 sps:$4 sm:$0xff]   ;;  %v891_v5 = vld [vmem:[%s1161_s1 + $0x50] ss:$8 sps:$4 sm:$0xff]  }
   0xd   : > { %422 = vmatpush1.bf16.msra.mxu0 %v885_v1  ;;  %v892_v6 = vld [vmem:[%s1161_s1 + $0x44] ss:$8 sps:$4 sm:$0xff]   ;;  %v894_v7 = vld [vmem:[%s1161_s1 + $0x40] ss:$8 sps:$4 sm:$0xff]   ;;  %v895_v8 = vld [vmem:[%s1161_s1 + $0x34] ss:$8 sps:$4 sm:$0xff]  }
   0xe   : > { %423 = vmatprep.subr.bf16.mxu0 %v886_v2  ;;  %s1166_s27 = smov (!%p192_p3, %s767_s27), 31  ;;  %v897_v9 = vld [vmem:[%s1161_s1 + $0x30] ss:$8 sps:$4 sm:$0xff]   ;;  %v898_v10 = vld [vmem:[%s1161_s1 + $0x24] ss:$8 sps:$4 sm:$0xff]  }
   0xf   : > { %s831_s14 = sshll.u32 %s1166_s27, 3  ;;  %v900_v11 = vld [vmem:[%s1161_s1 + $0x20] ss:$8 sps:$4 sm:$0xff]   ;;  %v901_v12 = vld [vmem:[%s1161_s1 + $0x14] ss:$8 sps:$4 sm:$0xff]   ;;  %s771_s25 = sshll.u32 %s1166_s27, 2 }
  0x10   : > { %s1036_s20 = scalar_lea.vmem %s1160_s0, %s831_s14  ;;  %v903_v14 = vld [vmem:[%s1161_s1 + $0x10] ss:$8 sps:$4 sm:$0xff]   ;;  %v904_v15 = vld [vmem:[%s1161_s1 + $0x4] ss:$8 sps:$4 sm:$0xff]   ;;  %v906_v17 = vld [vmem:[%s1161_s1] ss:$8 sps:$4 sm:$0xff]   ;;  %s202_s29 = scalar_lea.vmem %s1164_s4, %s771_s25 }
  0x11   : > { %424 = vmatpush1.bf16.msra.mxu0 %v888_v3  ;;  %v933_v13 = vld [vmem:[%s1036_s20 + $0x4] ss:$8 sps:$4 sm:$0xff]   ;;  %v937_v16 = vld [vmem:[%s1162_s2 + $0x78] sm:$0xff]   ;;  %v939_v20 = vld [vmem:[%s1162_s2 + $0x70] sm:$0xff]  }
  0x12   : > { %425 = vmatprep.subr.bf16.mxu0 %v889_v4  ;;  %453 = vmatprep.mubr.bf16.mxu0 %v933_v13  ;;  %v938_v18 = vld [vmem:[%s1162_s2 + $0x38] sm:$0xff]   ;;  %v940_v21 = vld [vmem:[%s1162_s2 + $0x30] sm:$0xff]   ;;  %v941_v22 = vld [vmem:[%s1162_s2 + $0x68] sm:$0xff]  }
  0x13   : > { %v907_v19 = vld [vmem:[%s1161_s1 + $0xf4] ss:$8 sps:$4 sm:$0xff]   ;;  %847 = vmatprep.subr.bf16.mxu1 %v937_v16  ;;  %v909_v23 = vld [vmem:[%s1161_s1 + $0xf0] ss:$8 sps:$4 sm:$0xff]   ;;  %v910_v24 = vld [vmem:[%s1161_s1 + $0xe4] ss:$8 sps:$4 sm:$0xff]  }
  0x14   : > { %848 = vmatpush3.bf16.msra.mxu1 %v938_v18  ;;  %v942_v25 = vld [vmem:[%s1162_s2 + $0x28] sm:$0xff]   ;;  %v943_v26 = vld [vmem:[%s1162_s2 + $0x60] sm:$0xff]   ;;  %v913_v29 = vld [vmem:[%s1161_s1 + $0xd4] ss:$8 sps:$4 sm:$0xff]  }
  0x15   : > { %426 = vmatpush1.bf16.msra.mxu0 %v891_v5  ;;  %849 = vmatprep.subr.bf16.mxu1 %v939_v20  ;;  %v912_v27 = vld [vmem:[%s1161_s1 + $0xe0] ss:$8 sps:$4 sm:$0xff]   ;;  %v945_v30 = vld [vmem:[%s1162_s2 + $0x58] sm:$0xff]   ;;  %v916_v33 = vld [vmem:[%s1161_s1 + $0xc4] ss:$8 sps:$4 sm:$0xff]  }
  0x16   : > { %427 = vmatprep.subr.bf16.mxu0 %v892_v6  ;;  %v944_v28 = vld [vmem:[%s1162_s2 + $0x20] sm:$0xff]   ;;  %v915_v31 = vld [vmem:[%s1161_s1 + $0xd0] ss:$8 sps:$4 sm:$0xff]   ;;  %v919_v35 = vld [vmem:[%s1161_s1 + $0xb4] ss:$8 sps:$4 sm:$0xff]  }
  0x17   : > { %v946_v32 = vld [vmem:[%s1162_s2 + $0x18] sm:$0xff]   ;;  %v918_v34 = vld [vmem:[%s1161_s1 + $0xc0] ss:$8 sps:$4 sm:$0xff]   ;;  %v922_v37 = vld [vmem:[%s1161_s1 + $0xa4] ss:$8 sps:$4 sm:$0xff]  }
  0x18   : > { %850 = vmatpush3.bf16.msra.mxu1 %v940_v21  ;;  %v921_v36 = vld [vmem:[%s1161_s1 + $0xb0] ss:$8 sps:$4 sm:$0xff]   ;;  %v924_v38 = vld [vmem:[%s1161_s1 + $0xa0] ss:$8 sps:$4 sm:$0xff]   ;;  %v925_v39 = vld [vmem:[%s1161_s1 + $0x94] ss:$8 sps:$4 sm:$0xff]  }
  0x19   : > { %428 = vmatpush1.bf16.msra.mxu0 %v894_v7  ;;  %851 = vmatprep.subr.bf16.mxu1 %v941_v22  ;;  %v927_v40 = vld [vmem:[%s1161_s1 + $0x90] ss:$8 sps:$4 sm:$0xff]   ;;  %v928_v41 = vld [vmem:[%s1161_s1 + $0x84] ss:$8 sps:$4 sm:$0xff]   ;;  %v930_v42 = vld [vmem:[%s1161_s1 + $0x80] ss:$8 sps:$4 sm:$0xff]  }
  0x1a   : > { %429 = vmatprep.subr.bf16.mxu0 %v895_v8  ;;  %v931_v43 = vld [vmem:[%s1036_s20] ss:$8 sps:$4 sm:$0xff]   ;;  %v934_v44 = vld [vmem:[%s1036_s20 + $0x14] ss:$8 sps:$4 sm:$0xff]   ;;  %v936_v45 = vld [vmem:[%s1036_s20 + $0x10] ss:$8 sps:$4 sm:$0xff]  }
  0x1b   : > { %v947_v46 = vld [vmem:[%s1162_s2 + $0x50] sm:$0xff]   ;;  %v949_v48 = vld [vmem:[%s1162_s2 + $0x48] sm:$0xff]   ;;  %v951_v50 = vld [vmem:[%s1162_s2 + $0x40] sm:$0xff]  }
  0x1c   : > { %852 = vmatpush3.bf16.msra.mxu1 %v942_v25  ;;  %v948_v47 = vld [vmem:[%s1162_s2 + $0x10] sm:$0xff]   ;;  %v950_v49 = vld [vmem:[%s1162_s2 + $0x8] sm:$0xff]   ;;  %v952_v51 = vld [vmem:[%s1162_s2] sm:$0xff]  }
  0x1d   : > { %430 = vmatpush1.bf16.msra.mxu0 %v897_v9  ;;  %853 = vmatprep.subr.bf16.mxu1 %v943_v26  ;;  %v808_v20 = vld [vmem:[%s1163_s3] ss:$0 sm:$0xff] }
  0x1e   : > { %431 = vmatprep.subr.bf16.mxu0 %v898_v10 }
  0x20   : > { %854 = vmatpush3.bf16.msra.mxu1 %v944_v28 }
  0x21   : > { %432 = vmatpush1.bf16.msra.mxu0 %v900_v11  ;;  %855 = vmatprep.subr.bf16.mxu1 %v945_v30 }
  0x22   : > { %433 = vmatprep.subr.bf16.mxu0 %v901_v12 }
  0x24   : > { %856 = vmatpush3.bf16.msra.mxu1 %v946_v32 }
  0x25   : > { %434 = vmatpush1.bf16.msra.mxu0 %v903_v14  ;;  %857 = vmatprep.subr.bf16.mxu1 %v947_v46 }
  0x26   : > { %435 = vmatprep.subr.bf16.mxu0 %v904_v15 }
  0x28   : > { %858 = vmatpush3.bf16.msra.mxu1 %v948_v47 }
  0x29   : > { %436 = vmatpush1.bf16.msra.mxu0 %v906_v17  ;;  %859 = vmatprep.subr.bf16.mxu1 %v949_v48 }
  0x2a   : > { %437 = vmatprep.subr.bf16.mxu0 %v907_v19 }
  0x2c   : > { %860 = vmatpush3.bf16.msra.mxu1 %v950_v49 }
  0x2d   : > { %438 = vmatpush2.bf16.msra.mxu0 %v909_v23  ;;  %861 = vmatprep.subr.bf16.mxu1 %v951_v50 }
  0x2e   : > { %439 = vmatprep.subr.bf16.mxu0 %v910_v24 }
  0x30   : > { %862 = vmatpush3.bf16.msra.mxu1 %v952_v51 }
  0x31   : > { %440 = vmatpush2.bf16.msra.mxu0 %v912_v27 }
  0x32   : > { %441 = vmatprep.subr.bf16.mxu0 %v913_v29 }
  0x35   : > { %442 = vmatpush2.bf16.msra.mxu0 %v915_v31 }
  0x36   : > { %443 = vmatprep.subr.bf16.mxu0 %v916_v33 }
  0x39   : > { %444 = vmatpush2.bf16.msra.mxu0 %v918_v34 }
  0x3a   : > { %445 = vmatprep.subr.bf16.mxu0 %v919_v35 }
  0x3d   : > { %446 = vmatpush2.bf16.msra.mxu0 %v921_v36 }
  0x3e   : > { %447 = vmatprep.subr.bf16.mxu0 %v922_v37 }
  0x41   : > { %448 = vmatpush2.bf16.msra.mxu0 %v924_v38 }
  0x42   : > { %449 = vmatprep.subr.bf16.mxu0 %v925_v39 }
  0x45   : > { %450 = vmatpush2.bf16.msra.mxu0 %v927_v40 }
  0x46   : > { %451 = vmatprep.subr.bf16.mxu0 %v928_v41 }
  0x49   : > { %452 = vmatpush2.bf16.msra.mxu0 %v930_v42 }
  0x4c   : > { %454 = vmatmul.mubr.bf16.vlgmr.msra.gmra.mxu0 %v931_v43 }
  0x4d   : > { %463 = vmatprep.mubr.bf16.mxu0 %v934_v44 }
  0x54   : > { %464 = vmatmul.mubr.bf16.gmra.mxu0 %v936_v45 }
 0x10c   : > { %v455_v52 = vpop.f32.mrf.mxu0 }
 0x10d   : > { %v482_v57 = vmul.f32 0.01, %v455_v52  ;;  %vm474_vm2 = vcmp.ge.f32.partialorder %v455_v52, 0.0 }
 0x10e   : > { %v457_v53 = vpop.f32.mrf.mxu0 }
 0x10f   : > { %v483_v55 = vmul.f32 0.01, %v457_v53  ;;  %vm475_vm1 = vcmp.ge.f32.partialorder %v457_v53, 0.0  ;;  %v490_v0 = vsel %vm474_vm2, %v455_v52, %v482_v57 }
 0x110   : > { %v459_v54 = vpop.f32.mrf.mxu0 }
 0x111   : > { %vm476_vm0 = vcmp.ge.f32.partialorder %v459_v54, 0.0  ;;  %v484_v56 = vmul.f32 0.01, %v459_v54  ;;  %v491_v62 = vsel %vm475_vm1, %v457_v53, %v483_v55 }
 0x112   : > { %v461_v58 = vpop.f32.mrf.mxu0 }
 0x113   : > { %v485_v59 = vmul.f32 0.01, %v461_v58  ;;  %vm477_vm3 = vcmp.ge.f32.partialorder %v461_v58, 0.0  ;;  %v492_v60 = vsel %vm476_vm0, %v459_v54, %v484_v56 }
 0x114   : > { %v465_v61 = vpop.f32.mrf.mxu0  ;;  %v498_v3 = vpack.c.bf16 %v492_v60, %v490_v0 }
 0x115   : > { %v493_v63 = vsel %vm477_vm3, %v461_v58, %v485_v59  ;;  %v486_v7 = vmul.f32 0.01, %v465_v61  ;;  %vm478_vm6 = vcmp.ge.f32.partialorder %v465_v61, 0.0 }
 0x116   : > { %v467_v1 = vpop.f32.mrf.mxu0  ;;  %v499_v2 = vpack.c.bf16 %v493_v63, %v491_v62 }
 0x117   : > { %v487_v5 = vmul.f32 0.01, %v467_v1  ;;  %vm479_vm5 = vcmp.ge.f32.partialorder %v467_v1, 0.0  ;;  %v494_v13 = vsel %vm478_vm6, %v465_v61, %v486_v7 }
 0x118   : > { %v469_v4 = vpop.f32.mrf.mxu0  ;;  %669 = vmatprep.mubr.bf16.mxu1 %v499_v2 }
 0x119   : > { %vm480_vm4 = vcmp.ge.f32.partialorder %v469_v4, 0.0  ;;  %v488_v6 = vmul.f32 0.01, %v469_v4  ;;  %670 = vmatmul.mubr.bf16.vlgmr.msra.gmra.mxu1 %v498_v3  ;;  %v495_v11 = vsel %vm479_vm5, %v467_v1, %v487_v5 }
 0x11a   : > { %v471_v8 = vpop.f32.mrf.mxu0 }
 0x11b   : > { %vm481_vm7 = vcmp.ge.f32.partialorder %v471_v8, 0.0  ;;  %v489_v9 = vmul.f32 0.01, %v471_v8  ;;  %v496_v10 = vsel %vm480_vm4, %v469_v4, %v488_v6 }
 0x11c   : > { %v500_v15 = vpack.c.bf16 %v496_v10, %v494_v13 }
 0x11d   : > { %v497_v12 = vsel %vm481_vm7, %v471_v8, %v489_v9 }
 0x11e   : > { %v501_v14 = vpack.c.bf16 %v497_v12, %v495_v11 }
 0x120   : > { %677 = vmatprep.mubr.bf16.mxu1 %v501_v14 }
 0x121   : > { %678 = vmatmul.mubr.bf16.gmra.mxu1 %v500_v15 }
 0x1d9   : > { %v863_v16 = vpop.f32.mrf.mxu1 }
 0x1db   : > { %v864_v17 = vpop.f32.mrf.mxu1 }
 0x1dc   : > { %v865_v19 = vadd.f32 %v864_v17, %v863_v16 }
 0x1dd   : > { %v866_v18 = vpop.f32.mrf.mxu1 }
 0x1de   : > { %v672_v24 = vadd.f32 %v865_v19, %v808_v20 }
 0x1df   : > { %v867_v21 = vpop.f32.mrf.mxu1 }
 0x1e0   : > { %v868_v22 = vadd.f32 %v867_v21, %v866_v18 }
 0x1e1   : > { %v869_v23 = vpop.f32.mrf.mxu1 }
 0x1e2   : > { %v675_v25 = vadd.f32 %v868_v22, %v808_v20 }
 0x1e3   : > { %v870_v26 = vpop.f32.mrf.mxu1 }
 0x1e4   : > { %v839_v27 = vpack.c.bf16 %v675_v25, %v672_v24  ;;  %v871_v29 = vadd.f32 %v870_v26, %v869_v23 }
 0x1e5   : > { %v872_v28 = vpop.f32.mrf.mxu1 }
 0x1e6   : > { %840 = vst [vmem:[%s202_s29] sm:$0xff] %v839_v27   ;;  %v680_v32 = vadd.f32 %v871_v29, %v808_v20 }
 0x1e7   : > { %v873_v30 = vpop.f32.mrf.mxu1 }
 0x1e8   : > { %v874_v31 = vadd.f32 %v873_v30, %v872_v28 }
 0x1ea   : > { %v683_v33 = vadd.f32 %v874_v31, %v808_v20 }
 0x1ec   : > { %v844_v34 = vpack.c.bf16 %v683_v33, %v680_v32 }
 0x1ee   : > { %846 = vst [vmem:[%s202_s29 + $0x8] sm:$0xff] %v844_v34  }
 0x1ef PF: > { %s14_s15 = sadd.s32 1, %s959_s15  }
 0x1f0   : > { %p11_p4 = scmp.ge.s32.totalorder %s14_s15, 10  }
 0x1f2   :  { %13 = sbr.rel (!%p11_p4) target bundleno = 1 (0x1), region = 66 }

</bundles_post_ra>
